<compile_context>
chip_gen: v5e
topology: v5e:2x2
jax: 0.10.0
libtpu: 0.0.40
codegen_flags: <defaults>
</compile_context>

<pallas_src>
import functools

import jax
import jax.numpy as jnp
from jax.experimental import pallas as pl
from jax.experimental.pallas import tpu as pltpu


# ---------------------------------------------------------------------------
# Kernels
# ---------------------------------------------------------------------------

def _fused_train_kernel(eps, inv_count_ref, batch_ref, sum_ref, sq_ref,
                        out_ref, new_sum_ref, new_sq_ref):
    """Single pass: accumulate stats over the full B and normalize one D tile."""
    x = batch_ref[...].astype(jnp.float32)                       # (B, tD)
    new_sum = sum_ref[...] + jnp.sum(x, axis=0, keepdims=True)   # (1, tD)
    new_sq = sq_ref[...] + jnp.sum(x * x, axis=0, keepdims=True)
    new_sum_ref[...] = new_sum
    new_sq_ref[...] = new_sq

    inv_count = inv_count_ref[0]                                  # SMEM scalar (>= clamped)
    mean = new_sum * inv_count
    var = jnp.maximum(new_sq * inv_count - mean * mean, 0.0)      # guard f32 cancellation
    inv_std = jnp.minimum(jax.lax.rsqrt(var), 1.0 / eps)          # == 1/clamp(sqrt(var), eps)
    out_ref[...] = ((x - mean) * inv_std).astype(out_ref.dtype)


def _reduce_kernel(batch_ref, sum_in_ref, sq_in_ref, new_sum_ref, new_sq_ref):
    """Large-B pass 1: accumulate sum / sum-of-squares over B tiles (B axis last, arbitrary)."""
    @pl.when(pl.program_id(1) == 0)
    def _():
        new_sum_ref[...] = sum_in_ref[...]
        new_sq_ref[...] = sq_in_ref[...]

    x = batch_ref[...].astype(jnp.float32)                        # (tB, tD)
    new_sum_ref[...] += jnp.sum(x, axis=0, keepdims=True)
    new_sq_ref[...] += jnp.sum(x * x, axis=0, keepdims=True)


def _normalize_kernel(eps, inv_count_ref, batch_ref, sum_ref, sq_ref, out_ref):
    """Eval / large-B pass 2: normalize with given statistics."""
    inv_count = inv_count_ref[0]
    mean = sum_ref[...] * inv_count                               # (1, tD)
    var = jnp.maximum(sq_ref[...] * inv_count - mean * mean, 0.0)
    inv_std = jnp.minimum(jax.lax.rsqrt(var), 1.0 / eps)
    x = batch_ref[...].astype(jnp.float32)                        # (tB, tD)
    out_ref[...] = ((x - mean) * inv_std).astype(out_ref.dtype)


# ---------------------------------------------------------------------------
# Tiling helpers
# ---------------------------------------------------------------------------

def _vmem_budget_bytes():
    """~75% of this generation's VMEM (v5e/v6e: 96 MiB cap, v7x: ~48 MiB)."""
    cap = None
    try:
        cap = int(pltpu.get_tpu_info().vmem_capacity_bytes)
    except Exception:
        cap = None
    if not cap:
        cap = 64 * 1024 * 1024            # conservative fallback (v7x per-TC physical)
    return min((cap * 3) // 4, 96 * 1024 * 1024)


def _fits(rows, tile_d, itemsize, budget):
    # Double-buffered working set: (rows, tile_d) in + out, plus 4 f32 stat rows.
    per_step = rows * tile_d * 2 * itemsize + 16 * tile_d
    return 2 * per_step <= budget


def _choose_feature_tile(D, rows, itemsize, budget):
    """Largest lane tile (multiple of 128 dividing D) fitting the budget; prefers >= 2
    grid steps so the 'parallel' feature axis shards over v7x's two TensorCores."""
    if D % 128 != 0:
        return D                          # full-D block: legal (equals array dim), no padding
    cands = [t for t in (8192, 4096, 2048, 1024, 512, 256, 128) if t <= D and D % t == 0]
    for min_steps in (2, 1):
        for t in cands:
            if D // t >= min_steps and _fits(rows, t, itemsize, budget):
                return t
    return 128


def _choose_row_tile(B, tD, itemsize, budget, exclude_full=False):
    for cand in (4096, 2048, 1024, 512, 256, 128, 64, 32, 16, 8):
        if cand < B and B % cand == 0 and _fits(cand, tD, itemsize, budget):
            return cand
    return None if exclude_full else B


# ---------------------------------------------------------------------------
# pallas_call wrappers
# ---------------------------------------------------------------------------

def _normalize_call(batch, sum2d, sq2d, inv_count, epsilon, tD, tB, budget):
    B, D = batch.shape
    nD, nB = D // tD, B // tB
    return pl.pallas_call(
        functools.partial(_normalize_kernel, float(epsilon)),
        grid=(nD, nB),
        in_specs=[
            pl.BlockSpec(memory_space=pltpu.MemorySpace.SMEM),          # inv_count (1,)
            pl.BlockSpec((tB, tD), lambda j, b: (b, j)),                # batch
            pl.BlockSpec((1, tD), lambda j, b: (0, j)),                 # acc_sum
            pl.BlockSpec((1, tD), lambda j, b: (0, j)),                 # acc_squared_sum
        ],
        out_specs=pl.BlockSpec((tB, tD), lambda j, b: (b, j)),
        out_shape=jax.ShapeDtypeStruct((B, D), batch.dtype),
        compiler_params=pltpu.CompilerParams(
            dimension_semantics=("parallel", "parallel"),
            vmem_limit_bytes=int(budget)),
    )(inv_count, batch, sum2d, sq2d)


def accumulated_normalization_forward(batch, acc_sum, acc_squared_sum,
                                      acc_count, num_accumulations,
                                      *, epsilon=1e-8, training=True,
                                      force_two_pass=False):
    """Matches AccumulatedNormalization.forward.

    batch:              (B, D)           any float dtype (output keeps it)
    acc_sum:            (1, D) float32   running buffer, kernel layout at rest
    acc_squared_sum:    (1, D) float32   running buffer, kernel layout at rest
    acc_count:          (1,)  float32
    num_accumulations:  (1,)  float32

    Returns (normalized, new_acc_sum, new_acc_squared_sum, new_acc_count,
             new_num_accumulations); stats stay in (1, D) float32 layout.
    """
    B, D = batch.shape
    itemsize = jnp.dtype(batch.dtype).itemsize
    budget = _vmem_budget_bytes()

    # Stats live at rest in kernel layout; reshape of a contiguous (D,) is metadata-only.
    if acc_sum.ndim == 1:
        acc_sum = acc_sum.reshape(1, -1)
    if acc_squared_sum.ndim == 1:
        acc_squared_sum = acc_squared_sum.reshape(1, -1)
    acc_sum = acc_sum.astype(jnp.float32)
    acc_squared_sum = acc_squared_sum.astype(jnp.float32)
    acc_count = acc_count.astype(jnp.float32)
    num_accumulations = num_accumulations.astype(jnp.float32)

    tD = _choose_feature_tile(D, B, itemsize, budget)
    nD = D // tD

    if training:
        new_count = acc_count + jnp.float32(B)
        new_num = num_accumulations + jnp.float32(1.0)
        inv_count = (1.0 / jnp.maximum(new_count, 1.0)).astype(jnp.float32)  # SMEM scalar

        fused_ok = _fits(B, tD, itemsize, budget) and not force_two_pass
        tB = None
        if not fused_ok:
            tB = _choose_row_tile(B, tD, itemsize, budget, exclude_full=True)
            if tB is None:
                # TODO(synk): B not divisible into fitting row tiles -> fall back to fused
                # (may exceed the VMEM budget for pathological shapes).
                fused_ok = True

        if fused_ok:
            out, new_sum, new_sq = pl.pallas_call(
                functools.partial(_fused_train_kernel, float(epsilon)),
                grid=(nD,),
                in_specs=[
                    pl.BlockSpec(memory_space=pltpu.MemorySpace.SMEM),   # inv_count
                    pl.BlockSpec((B, tD), lambda j: (0, j)),             # batch
                    pl.BlockSpec((1, tD), lambda j: (0, j)),             # acc_sum
                    pl.BlockSpec((1, tD), lambda j: (0, j)),             # acc_squared_sum
                ],
                out_specs=(
                    pl.BlockSpec((B, tD), lambda j: (0, j)),
                    pl.BlockSpec((1, tD), lambda j: (0, j)),
                    pl.BlockSpec((1, tD), lambda j: (0, j)),
                ),
                out_shape=(
                    jax.ShapeDtypeStruct((B, D), batch.dtype),
                    jax.ShapeDtypeStruct((1, D), jnp.float32),
                    jax.ShapeDtypeStruct((1, D), jnp.float32),
                ),
                # Inputs: 0=inv_count(SMEM), 1=batch, 2=acc_sum, 3=acc_squared_sum.
                # Real in-place update of the running buffers (same layout at rest).
                input_output_aliases={2: 1, 3: 2},
                compiler_params=pltpu.CompilerParams(
                    dimension_semantics=("parallel",),
                    vmem_limit_bytes=int(budget)),
            )(inv_count, batch, acc_sum, acc_squared_sum)
        else:
            # Large-B two-pass: (1) B-arbitrary reduction, (2) parallel normalization.
            nB = B // tB
            new_sum, new_sq = pl.pallas_call(
                _reduce_kernel,
                grid=(nD, nB),
                in_specs=[
                    pl.BlockSpec((tB, tD), lambda j, b: (b, j)),
                    pl.BlockSpec((1, tD), lambda j, b: (0, j)),
                    pl.BlockSpec((1, tD), lambda j, b: (0, j)),
                ],
                out_specs=(
                    pl.BlockSpec((1, tD), lambda j, b: (0, j)),
                    pl.BlockSpec((1, tD), lambda j, b: (0, j)),
                ),
                out_shape=(
                    jax.ShapeDtypeStruct((1, D), jnp.float32),
                    jax.ShapeDtypeStruct((1, D), jnp.float32),
                ),
                compiler_params=pltpu.CompilerParams(
                    dimension_semantics=("parallel", "arbitrary"),
                    vmem_limit_bytes=int(budget)),
            )(batch, acc_sum, acc_squared_sum)
            out = _normalize_call(batch, new_sum, new_sq, inv_count, epsilon,
                                  tD, tB, budget)
        return out, new_sum, new_sq, new_count, new_num

    # ----- eval: buffers untouched -----
    inv_count = (1.0 / jnp.maximum(acc_count, 1.0)).astype(jnp.float32)
    tB = B
    if (not _fits(B, tD, itemsize, budget)) or (nD == 1 and B >= 16):
        cand = _choose_row_tile(B, tD, itemsize, budget, exclude_full=True)
        if cand is not None:
            tB = cand
    out = _normalize_call(batch, acc_sum, acc_squared_sum, inv_count, epsilon,
                          tD, tB, budget)
    return out, acc_sum, acc_squared_sum, acc_count, num_accumulations


# ---------------------------------------------------------------------------
# Pure-JAX reference (mirrors the PyTorch module)
# ---------------------------------------------------------------------------

def _reference_forward(batch, acc_sum, acc_sq, acc_count, num_acc,
                       epsilon=1e-8, training=True):
    B = batch.shape[0]
    x = batch.astype(jnp.float32)
    if training:
        acc_sum = acc_sum + x.sum(axis=0, keepdims=True)
        acc_sq = acc_sq + (x * x).sum(axis=0, keepdims=True)
        acc_count = acc_count + B
        num_acc = num_acc + 1
    count_safe = jnp.maximum(acc_count, 1.0)
    mean = acc_sum / count_safe
    std = jnp.maximum(jnp.sqrt(acc_sq / count_safe - mean * mean), epsilon)
    out = ((x - mean) / std).astype(batch.dtype)
    return out, acc_sum, acc_sq, acc_count, num_acc


def _check(got, want, name):
    out_g, sum_g, sq_g, cnt_g, num_g = got
    out_w, sum_w, sq_w, cnt_w, num_w = want
    jax.block_until_ready(out_g)
    assert jnp.allclose(out_g, out_w, atol=1e-4, rtol=1e-4), f"{name}: out mismatch"
    assert jnp.allclose(sum_g, sum_w, atol=1e-4, rtol=1e-4), f"{name}: acc_sum mismatch"
    assert jnp.allclose(sq_g, sq_w, atol=1e-4, rtol=1e-4), f"{name}: acc_sq mismatch"
    assert jnp.allclose(cnt_g, cnt_w), f"{name}: acc_count mismatch"
    assert jnp.allclose(num_g, num_w), f"{name}: num_accumulations mismatch"


if __name__ == "__main__":
    key = jax.random.PRNGKey(0)
    k1, k2, k3 = jax.random.split(key, 3)

    # ---- Config A: lane-aligned feature dim ----
    B, D = 8, 256
    batch = jax.random.normal(k1, (B, D), jnp.float32) * 2.0 + 0.5
    acc_sum = jnp.zeros((1, D), jnp.float32)
    acc_sq = jnp.zeros((1, D), jnp.float32)
    cnt = jnp.zeros((1,), jnp.float32)
    num = jnp.zeros((1,), jnp.float32)

    ref1 = _reference_forward(batch, acc_sum, acc_sq, cnt, num, training=True)
    got1 = accumulated_normalization_forward(batch, acc_sum, acc_sq, cnt, num, training=True)
    _check(got1, ref1, "train step 1")

    batch2 = batch * 0.3 - 1.0
    ref2 = _reference_forward(batch2, ref1[1], ref1[2], ref1[3], ref1[4], training=True)
    got2 = accumulated_normalization_forward(batch2, got1[1], got1[2], got1[3], got1[4],
                                             training=True)
    _check(got2, ref2, "train step 2")

    ref3 = _reference_forward(batch, ref2[1], ref2[2], ref2[3], ref2[4], training=False)
    got3 = accumulated_normalization_forward(batch, got2[1], got2[2], got2[3], got2[4],
                                             training=False)
    _check(got3, ref3, "eval")

    # ---- Config B: large-batch two-pass training path (forced) ----
    Bb = 64
    batchb = jax.random.normal(k2, (Bb, D), jnp.float32)
    refb = _reference_forward(batchb, acc_sum, acc_sq, cnt, num, training=True)
    gotb = accumulated_normalization_forward(batchb, acc_sum, acc_sq, cnt, num,
                                             training=True, force_two_pass=True)
    _check(gotb, refb, "two-pass train")

    # ---- Config C: ragged feature dim (D % 128 != 0) -> full-D block, no pad/slice ----
    Dr = 96
    batchr = jax.random.normal(k3, (B, Dr), jnp.float32) + 3.0
    accr_sum = jnp.zeros((1, Dr), jnp.float32)
    accr_sq = jnp.zeros((1, Dr), jnp.float32)
    refr = _reference_forward(batchr, accr_sum, accr_sq, cnt, num, training=True)
    gotr = accumulated_normalization_forward(batchr, accr_sum, accr_sq, cnt, num, training=True)
    _check(gotr, refr, "ragged-D train")

    print("KERNEL_OK")
</pallas_src>

<mosaic_0001>
module attributes {stable_mosaic.version = 11 : i64} {
  func.func @_fused_train_kernel(%arg0: i32, %arg1: memref<1xf32, #tpu.memory_space<smem>>, %arg2: memref<8x128xf32, #tpu.memory_space<vmem>>, %arg3: memref<1x128xf32, #tpu.memory_space<vmem>>, %arg4: memref<1x128xf32, #tpu.memory_space<vmem>>, %arg5: memref<8x128xf32, #tpu.memory_space<vmem>>, %arg6: memref<1x128xf32, #tpu.memory_space<vmem>>, %arg7: memref<1x128xf32, #tpu.memory_space<vmem>>) attributes {dimension_semantics = [#tpu.dimension_semantics<parallel>], iteration_bounds = array<i64: 2>, scalar_prefetch = 0 : i64, scratch_operands = 0 : i64, tpu.core_type = #tpu.core_type<tc>, window_params = [{transform_indices = @transform_0, window_bounds = array<i64: 1>}, {transform_indices = @transform_1, window_bounds = array<i64: 8, 128>}, {transform_indices = @transform_2, window_bounds = array<i64: 1, 128>}, {transform_indices = @transform_3, window_bounds = array<i64: 1, 128>}, {transform_indices = @transform_4, window_bounds = array<i64: 8, 128>}, {transform_indices = @transform_5, window_bounds = array<i64: 1, 128>}, {transform_indices = @transform_6, window_bounds = array<i64: 1, 128>}]} {
    %c0 = arith.constant 0 : index
    %c0_0 = arith.constant 0 : index
    %0 = vector.load %arg2[%c0, %c0_0] : memref<8x128xf32, #tpu.memory_space<vmem>>, vector<8x128xf32>
    %c0_1 = arith.constant 0 : index
    %c0_2 = arith.constant 0 : index
    %1 = vector.load %arg3[%c0_1, %c0_2] : memref<1x128xf32, #tpu.memory_space<vmem>>, vector<1x128xf32>
    %cst = arith.constant dense<0.000000e+00> : vector<128xf32>
    %2 = vector.multi_reduction <add>, %0, %cst [0] : vector<8x128xf32> to vector<128xf32>
    %3 = vector.shape_cast %2 : vector<128xf32> to vector<1x128xf32>
    %4 = arith.addf %1, %3 : vector<1x128xf32>
    %c0_3 = arith.constant 0 : index
    %c0_4 = arith.constant 0 : index
    %5 = vector.load %arg4[%c0_3, %c0_4] : memref<1x128xf32, #tpu.memory_space<vmem>>, vector<1x128xf32>
    %6 = arith.mulf %0, %0 : vector<8x128xf32>
    %cst_5 = arith.constant dense<0.000000e+00> : vector<128xf32>
    %7 = vector.multi_reduction <add>, %6, %cst_5 [0] : vector<8x128xf32> to vector<128xf32>
    %8 = vector.shape_cast %7 : vector<128xf32> to vector<1x128xf32>
    %9 = arith.addf %5, %8 : vector<1x128xf32>
    %c0_6 = arith.constant 0 : index
    %c0_7 = arith.constant 0 : index
    %10 = vector.load %arg6[%c0_6, %c0_7] : memref<1x128xf32, #tpu.memory_space<vmem>>, vector<1x128xf32>
    tpu.vector_store %arg6[%c0_6, %c0_7], %4 {strides = array<i32>} : memref<1x128xf32, #tpu.memory_space<vmem>>, vector<1x128xf32>,
    %c0_8 = arith.constant 0 : index
    %c0_9 = arith.constant 0 : index
    %11 = vector.load %arg7[%c0_8, %c0_9] : memref<1x128xf32, #tpu.memory_space<vmem>>, vector<1x128xf32>
    tpu.vector_store %arg7[%c0_8, %c0_9], %9 {strides = array<i32>} : memref<1x128xf32, #tpu.memory_space<vmem>>, vector<1x128xf32>,
    %c0_10 = arith.constant 0 : index
    %12 = memref.load %arg1[%c0_10] : memref<1xf32, #tpu.memory_space<smem>>
    %13 = vector.broadcast %12 : f32 to vector<1x128xf32>
    %14 = arith.mulf %4, %13 : vector<1x128xf32>
    %15 = vector.broadcast %12 : f32 to vector<1x128xf32>
    %16 = arith.mulf %9, %15 : vector<1x128xf32>
    %17 = arith.mulf %14, %14 : vector<1x128xf32>
    %18 = arith.subf %16, %17 : vector<1x128xf32>
    %cst_11 = arith.constant 0.000000e+00 : f32
    %19 = vector.broadcast %cst_11 : f32 to vector<1x128xf32>
    %20 = arith.maximumf %18, %19 : vector<1x128xf32>
    %21 = math.rsqrt %20 : vector<1x128xf32>
    %cst_12 = arith.constant 1.000000e+08 : f32
    %22 = vector.broadcast %cst_12 : f32 to vector<1x128xf32>
    %23 = arith.minimumf %21, %22 : vector<1x128xf32>
    %24 = vector.broadcast %14 : vector<1x128xf32> to vector<8x128xf32>
    %25 = arith.subf %0, %24 : vector<8x128xf32>
    %26 = vector.broadcast %23 : vector<1x128xf32> to vector<8x128xf32>
    %27 = arith.mulf %25, %26 : vector<8x128xf32>
    %c0_13 = arith.constant 0 : index
    %c0_14 = arith.constant 0 : index
    %28 = vector.load %arg5[%c0_13, %c0_14] : memref<8x128xf32, #tpu.memory_space<vmem>>, vector<8x128xf32>
    tpu.vector_store %arg5[%c0_13, %c0_14], %27 {strides = array<i32>} : memref<8x128xf32, #tpu.memory_space<vmem>>, vector<8x128xf32>,
    return
  }
  func.func @transform_0(%arg0: i32) -> i32 {
    %c0_i32 = arith.constant 0 : i32
    %c0_i32_0 = arith.constant 0 : i32
    return %c0_i32 : i32
  }
  func.func @transform_1(%arg0: i32) -> (i32, i32) {
    %c0_i32 = arith.constant 0 : i32
    %c0_i32_0 = arith.constant 0 : i32
    return %c0_i32, %arg0 : i32, i32
  }
  func.func @transform_2(%arg0: i32) -> (i32, i32) {
    %c0_i32 = arith.constant 0 : i32
    %c0_i32_0 = arith.constant 0 : i32
    return %c0_i32, %arg0 : i32, i32
  }
  func.func @transform_3(%arg0: i32) -> (i32, i32) {
    %c0_i32 = arith.constant 0 : i32
    %c0_i32_0 = arith.constant 0 : i32
    return %c0_i32, %arg0 : i32, i32
  }
  func.func @transform_4(%arg0: i32) -> (i32, i32) {
    %c0_i32 = arith.constant 0 : i32
    %c0_i32_0 = arith.constant 0 : i32
    return %c0_i32, %arg0 : i32, i32
  }
  func.func @transform_5(%arg0: i32) -> (i32, i32) {
    %c0_i32 = arith.constant 0 : i32
    %c0_i32_0 = arith.constant 0 : i32
    return %c0_i32, %arg0 : i32, i32
  }
  func.func @transform_6(%arg0: i32) -> (i32, i32) {
    %c0_i32 = arith.constant 0 : i32
    %c0_i32_0 = arith.constant 0 : i32
    return %c0_i32, %arg0 : i32, i32
  }
}

</mosaic_0001>

<bundles_post_ra>
// kernel: tpu_custom_call.1
= control target key start
LH: loop header
LB: loop body
LE: loop exit
PB: predicated region body
PF: predicated region fallthrough
CT: control target
= control target key end

     0   :  { %s1200_s0 = inlined_call_operand.<no memory space> [shape: f32[1], index: 0, kind: input, shape index: {}]   ;;  %s1201_s1 = inlined_call_operand.hbm [shape: f32[8,256], index: 1, kind: input, shape index: {}]   ;;  %s1202_s2 = inlined_call_operand.hbm [shape: f32[1,256], index: 2, kind: input, shape index: {}, may-alias: {2,5}]   ;;  %s1203_s3 = inlined_call_operand.hbm [shape: f32[1,256], index: 3, kind: input, shape index: {}, may-alias: {3,6}]   ;;  %s1204_s4 = inlined_call_operand.hbm [shape: f32[8,256], index: 4, kind: output, shape index: {0}]   ;;  %s1205_s5 = inlined_call_operand.hbm [shape: f32[1,256], index: 5, kind: output, shape index: {1}, may-alias: {2,5}]   ;;  %s1206_s6 = inlined_call_operand.hbm [shape: f32[1,256], index: 6, kind: output, shape index: {2}, may-alias: {3,6}]  }
   0x1   :  { %1209 = sst [smem:[#allocation19_spill]] %s1202_s2 }
   0x2   :  { %12 = sst [smem:[#allocation2]] %s1200_s0 }
   0x3   :  { %13 = vsyncpa [#allocation4], 0 }
   0x4   :  { %15 = vsyncpa [#allocation4 + $0x1], 0 }
   0x5   :  { %16 = vsyncpa [#allocation7], 0 }
   0x6   :  { %18 = vsyncpa [#allocation7 + $0x1], 0 }
   0x7   :  { %19 = vsyncpa [#allocation5], 0 }
   0x8   :  { %21 = vsyncpa [#allocation5 + $0x1], 0 }
   0x9   :  { %22 = vsyncpa [#allocation11], 0 }
   0xa   :  { %24 = vsyncpa [#allocation11 + $0x1], 0  ;;  %s948_s23 = smov 0   ;;  %s950_s24 = smov 0  }
   0xb   :  { %s952_s25 = smov 0   ;;  %s954_s26 = smov 0  }
   0xc LB: > { %1210 = sst [smem:[#allocation17_spill]] %s904_s25  ;;  %s969_s0 = sadd.s32 4294967295, %s908_s26   ;;  %s908_s26 = sphi %s954_s26, %s1223_s26   ;;  %s904_s25 = sphi %s952_s25, %s1220_s25   ;;  %s900_s24 = sphi %s950_s24, %s1222_s24   ;;  %s896_s23 = sphi %s948_s23, %s1221_s23  }
   0xd   : > { %s1207_s27 = sadd.s32 4294967294, %s908_s26   ;;  %s973_s28 = sadd.s32 1, %s908_s26  }
   0xe   : > { %s58_s29 = sadd.s32 1, %s904_s25  ;;  %s55_s30 = ssub.s32 %s908_s26, %s973_s28 }
   0xf   : > { %p65_p0 = scmp.ne.s32.totalorder %s904_s25, %s900_s24  ;;  %p56_p1 = scmp.eq.s32.totalorder %s55_s30, 0 }
  0x10   : > { %p66_p2 = scmp.eq.s32.totalorder %s908_s26, 0  ;;  %p71_p3 = scmp.ne.s32.totalorder %s900_s24, %s896_s23 }
  0x11   : > { %p72_p4 = scmp.eq.s32.totalorder %s969_s0, 0  ;;  %p147_p7 = scmp.eq.s32.totalorder %s969_s0, 1 }
  0x12   : > { %s985_s7 = scalar_select %p56_p1, %s904_s25, %s58_s29  }
  0x13   : > { %p67_p5 = por %p66_p2, %p65_p0  ;;  %p987_p6 = por %p72_p4, %p71_p3 }
  0x14   : > { %1211 = sst [smem:[#allocation18_spill]] %s985_s7  ;;  %p153_p8 = scmp.eq.s32.totalorder %s1207_s27, 1 }
  0x15   : > { %p610_p9 = scmp.ge.s32.totalorder %s908_s26, 2  ;;  %p652_p10 = scmp.lt.s32.totalorder %s908_s26, 2 }
  0x16   : > { %p996_p11 = por %p147_p7, %p65_p0  ;;  %p1000_p12 = por %p153_p8, %p71_p3 }
  0x17   : > { %s1005_s11 = sand.u32 1, %s904_s25   ;;  %p1007_p13 = pnand %p652_p10, %p67_p5 }
  0x18   : > { %s247_s13 = sand.u32 1, %s908_s26   ;;  %s1216_s2 = sld [smem:[#allocation19_spill]] }
  0x19   : > { %s250_s17 = scalar_lea.vmem [#allocation6], %s1005_s11  ;;  %p613_p0 = scmp.ge.s32.totalorder %s908_s26, 1 }
  0x1a   : > { %s257_s18 = sshll.u32 %s250_s17, 4  ;;  %s1018_s20 = scalar_lea.sflag [#allocation7], %s247_s13  ;;  %s258_s18 = int_to_ptr.vmem [resolvable:$true] %s257_s18 }
  0x1b   : > { %p692_p2 = pneg %p1007_p13 }
  0x1e   : > { %s253_s16 = scalar_lea.hbm %s1216_s2, %s908_s26  ;;  %s695_s14 = scalar_lea.hbm %s1216_s2, 2 }
  0x1f   : > { %s255_s19 = sshll.u32 %s253_s16, 4  ;;  %s256_s19 = int_to_ptr.hbm [resolvable:$true] %s255_s19 }
  0x20   : > { %s688_s21 = sshra.s32 %s256_s19, 4  ;;  %s689_s21 = int_to_ptr.hbm [resolvable:$true] %s688_s21 }
  0x21   : > { %s690_s22 = scalar_lea.hbm %s689_s21, 1  ;;  %p696_p5 = scmp.lt.s32.totalorder %s689_s21, %s1216_s2 }
  0x22   : > { %p691_p1 = scmp.ne.s32.totalorder %s689_s21, %s690_s22  ;;  %p697_p7 = scmp.lt.s32.totalorder %s695_s14, %s690_s22 }
  0x24   : > { %p693_p3 = pnand %p692_p2, %p691_p1  ;;  %p698_p8 = por %p697_p7, %p696_p5 }
  0x26   : > { %p694_p4 = pneg %p693_p3 }
  0x28   : > { %p699_p10 = pnand %p698_p8, %p694_p4 }
  0x2a   : > { %702 = shalt.err (!%p699_p10)
}
  0x2b   : > { %638 = dma.hbm_to_vmem [thread:$0]  (!%p1007_p13), %s256_s19, 16, %s258_s18, %s1018_s20  }
  0x2c   : > { %p279_p1 = scmp.lt.s32.totalorder %s908_s26, 3  ;;  %s611_s13 = sshll.u32 %s1005_s11, 3 }
  0x2d   : > { %s612_s17 = sshll.u32 %s908_s26, 3  ;;  %s232_s14 = scalar_lea.vmem [#allocation3], %s611_s13 }
  0x2e   : > { %p1039_p3 = pnand %p613_p0, %p279_p1  ;;  %s236_s30 = scalar_lea.hbm %s1201_s1, %s612_s17 }
  0x2f   : > { %s240_s15 = sshll.u32 %s232_s14, 4  ;;  %s238_s16 = sshll.u32 %s236_s30, 4  ;;  %s241_s15 = int_to_ptr.vmem [resolvable:$true] %s240_s15  ;;  %s239_s16 = int_to_ptr.hbm [resolvable:$true] %s238_s16 }
  0x30   : > { %s229_s27 = scalar_lea.sflag [#allocation4], %s1005_s11  ;;  %s718_s18 = sshra.s32 %s239_s16, 4  ;;  %s719_s18 = int_to_ptr.hbm [resolvable:$true] %s718_s18 }
  0x31   : > { %s720_s19 = scalar_lea.hbm %s719_s18, 8  ;;  %s725_s25 = scalar_lea.hbm %s1201_s1, 16 }
  0x32   : > { %p721_p4 = scmp.ne.s32.totalorder %s719_s18, %s720_s19  ;;  %p726_p7 = scmp.lt.s32.totalorder %s719_s18, %s1201_s1 }
  0x33   : > { %p727_p8 = scmp.lt.s32.totalorder %s725_s25, %s720_s19 }
  0x34   : > { %p723_p0 = pnand %p721_p4, %p692_p2 }
  0x35   : > { %p728_p10 = por %p727_p8, %p726_p7 }
  0x36   : > { %p724_p5 = pneg %p723_p0 }
  0x38   : > { %p729_p1 = pnand %p728_p10, %p724_p5 }
  0x3a   : > { %732 = shalt.err (!%p729_p1)
}
  0x3b   : > { %635 = dma.hbm_to_vmem [thread:$0]  (!%p1007_p13), %s239_s16, 128, %s241_s15, %s229_s27  }
  0x3c   : > { %s270_s30 = scalar_lea.hbm %s1203_s3, %s908_s26  ;;  %s267_s2 = scalar_lea.vmem [#allocation8], %s1005_s11 }
  0x3d   : > { %s274_s7 = sshll.u32 %s267_s2, 4  ;;  %s272_s14 = sshll.u32 %s270_s30, 4  ;;  %s275_s7 = int_to_ptr.vmem [resolvable:$true] %s274_s7  ;;  %s273_s14 = int_to_ptr.hbm [resolvable:$true] %s272_s14 }
  0x3e   : > { %s748_s18 = sshra.s32 %s273_s14, 4  ;;  %s755_s27 = scalar_lea.hbm %s1203_s3, 2  ;;  %s749_s18 = int_to_ptr.hbm [resolvable:$true] %s748_s18 }
  0x3f   : > { %s750_s25 = scalar_lea.hbm %s749_s18, 1  ;;  %p756_p7 = scmp.lt.s32.totalorder %s749_s18, %s1203_s3 }
  0x40   : > { %p751_p4 = scmp.ne.s32.totalorder %s749_s18, %s750_s25  ;;  %p757_p8 = scmp.lt.s32.totalorder %s755_s27, %s750_s25 }
  0x42   : > { %p753_p0 = pnand %p751_p4, %p692_p2  ;;  %p758_p10 = por %p757_p8, %p756_p7 }
  0x44   : > { %p754_p5 = pneg %p753_p0 }
  0x46   : > { %p759_p1 = pnand %p758_p10, %p754_p5 }
  0x48   : > { %762 = shalt.err (!%p759_p1)
}
  0x49   : > { %641 = dma.hbm_to_vmem [thread:$0]  (!%p1007_p13), %s273_s14, 16, %s275_s7, %s1018_s20  }
  0x4a   : > { %283 = sbr.rel (%p1039_p3) target bundleno = 143 (0x8f), region = 36  ;;  %s1078_s11 = sand.u32 (!%p1039_p3), 1, %s900_s24  }
  0x4b   : > { %s614_s17 = sshll.u32 (!%p1039_p3), %s1078_s11, 3  ;;  %s286_s13 = scalar_lea.sflag (!%p1039_p3), [#allocation4], %s1078_s11 }
  0x4c   : > { %s289_s29 = scalar_lea.vmem (!%p1039_p3), [#allocation3], %s614_s17 }
  0x4f   : > { %879 = dma.done.wait (%p987_p6), %s286_s13, 128  }
  0x50   : > { %881 = vsyncadd (%p987_p6), %s286_s13, 4294967168  ;;  %s295_s12 = sand.u32 1, %s969_s0   ;;  %s298_s21 = scalar_lea.vmem [#allocation6], %s1078_s11 }
  0x51   : > { %s296_s20 = scalar_lea.sflag [#allocation7], %s295_s12 }
  0x52   : > { %883 = dma.done.wait (%p987_p6), %s296_s20, 32  }
  0x53   : > { %885 = vsyncadd (%p987_p6), %s296_s20, 4294967264  ;;  %v1096_v0 = vld [vmem:[%s289_s29] sm:$0xff]  ;;  %s1102_s30 = sld [smem:[#allocation2]]  ;;  %s432_s7 = scalar_lea.hbm %s1205_s5, %s969_s0 }
  0x54   : > { %v355_v1 = vrot.slane %v1096_v0, 4  ;;  %v363_v2 = vmul.f32 %v1096_v0, %v1096_v0  ;;  %s346_s14 = scalar_lea.vmem [#allocation10], %s1078_s11  ;;  %s445_s22 = scalar_lea.hbm %s1206_s6, %s969_s0  ;;  %v354_v11 = vld [vmem:[%s298_s21] sm:$0x1] }
  0x55   : > { %s1109_s18 = sshll.u32 %s346_s14, 4  ;;  %s1115_s27 = sshll.u32 %s432_s7, 4  ;;  %s435_s18 = int_to_ptr.vmem [resolvable:$true] %s1109_s18  ;;  %s437_s27 = int_to_ptr.hbm [resolvable:$true] %s1115_s27 }
  0x56   : > { %v356_v3 = vadd.f32 %v355_v1, %v1096_v0  ;;  %v364_v4 = vrot.slane %v363_v2, 4  ;;  %s307_s15 = scalar_lea.vmem [#allocation8], %s1078_s11  ;;  %s352_s16 = scalar_lea.vmem [#allocation12], %s1078_s11 }
  0x57   : > { %v362_v15 = vld [vmem:[%s307_s15] sm:$0x1]  ;;  %s1121_s13 = sshll.u32 %s352_s16, 4  ;;  %s1123_s29 = sshll.u32 %s445_s22, 4  ;;  %s448_s13 = int_to_ptr.vmem [resolvable:$true] %s1121_s13  ;;  %s450_s29 = int_to_ptr.hbm [resolvable:$true] %s1123_s29 }
  0x58   : > { %v357_v5 = vrot.slane %v356_v3, 2  ;;  %v365_v6 = vadd.f32 %v364_v4, %v363_v2  ;;  %s1130_s20 = scalar_lea.sflag [#allocation11], %s295_s12  ;;  %s792_s21 = sshra.s32 %s437_s27, 4  ;;  %s793_s21 = int_to_ptr.hbm [resolvable:$true] %s792_s21 }
  0x59   : > { %v374_v14 = vstv %s1102_s30  ;;  %s794_s30 = scalar_lea.hbm %s793_s21, 1  ;;  %s798_s7 = scalar_lea.hbm %s1205_s5, 2 }
  0x5a   : > { %v358_v7 = vadd.f32 %v357_v5, %v356_v3  ;;  %v366_v8 = vrot.slane %v365_v6, 2  ;;  %p795_p6 = scmp.ne.s32.totalorder %s793_s21, %s794_s30  ;;  %p799_p3 = scmp.lt.s32.totalorder %s793_s21, %s1205_s5 }
  0x5b   : > { %p800_p4 = scmp.lt.s32.totalorder %s798_s7, %s794_s30 }
  0x5c   : > { %v359_v9 = vrot.slane %v358_v7, 1  ;;  %v367_v10 = vadd.f32 %v366_v8, %v365_v6  ;;  %p796_p13 = pnand %p795_p6, %p996_p11 }
  0x5d   : > { %p801_p0 = por %p800_p4, %p799_p3 }
  0x5e   : > { %v360_v12 = vadd.f32 %v359_v9, %v358_v7  ;;  %v368_v13 = vrot.slane %v367_v10, 1  ;;  %p797_p2 = pneg %p796_p13 }
  0x60   : > { %v361_v16 = vadd.f32 %v360_v12, %v354_v11  ;;  %v369_v17 = vadd.f32 %v368_v13, %v367_v10  ;;  %p802_p5 = pnand %p801_p0, %p797_p2 }
  0x62   : > { %371 = vst [vmem:[%s346_s14] sm:$0x1] %v361_v16  ;;  %v375_v18 = vmul.f32 %v374_v14, %v361_v16  ;;  %v370_v19 = vadd.f32 %v369_v17, %v362_v15 }
  0x63   : > { %805 = shalt.err (!%p802_p5)
}
  0x64   : > { %627 = dma.vmem_to_hbm [thread:$0]  (%p996_p11), %s435_s18, 16, %s437_s27, %s1130_s20   ;;  %v377_v20 = vmul.f32 %v375_v18, %v375_v18  ;;  %372 = vst [vmem:[%s352_s16] sm:$0x1] %v370_v19  ;;  %v376_v21 = vmul.f32 %v374_v14, %v370_v19 }
  0x65   : > { %s820_s12 = sshra.s32 %s450_s29, 4  ;;  %s826_s21 = scalar_lea.hbm %s1206_s6, 2  ;;  %s821_s12 = int_to_ptr.hbm [resolvable:$true] %s820_s12 }
  0x66   : > { %s822_s19 = scalar_lea.hbm %s821_s12, 1  ;;  %p827_p1 = scmp.lt.s32.totalorder %s821_s12, %s1206_s6 }
  0x67   : > { %p823_p7 = scmp.ne.s32.totalorder %s821_s12, %s822_s19  ;;  %p828_p6 = scmp.lt.s32.totalorder %s826_s21, %s822_s19 }
  0x69   : > { %p824_p8 = pnand %p823_p7, %p996_p11  ;;  %p829_p13 = por %p828_p6, %p827_p1 }
  0x6b   : > { %p825_p10 = pneg %p824_p8 }
  0x6d   : > { %p830_p2 = pnand %p829_p13, %p825_p10 }
  0x6f   : > { %833 = shalt.err (!%p830_p2)
}
  0x70   : > { %628 = dma.vmem_to_hbm [thread:$0]  (%p996_p11), %s448_s13, 16, %s450_s29, %s1130_s20   ;;  %v378_v22 = vsub.f32 %v376_v21, %v377_v20  ;;  %v392_v29 = vperm.slane %v375_v18, 0 }
  0x71   : > { %s617_s18 = sshll.u32 %s969_s0, 3  ;;  %s340_s29 = scalar_lea.vmem [#allocation9], %s614_s17 }
  0x72   : > { %v379_v23 = vmax.f32 %v378_v22, 0.0  ;;  %s419_s13 = scalar_lea.hbm %s1204_s4, %s617_s18  ;;  %v394_v33 = vsub.f32 %v1096_v0, %v392_v29  ;;  %s421_s20 = sshll.u32 %s340_s29, 4  ;;  %s422_s20 = int_to_ptr.vmem [resolvable:$true] %s421_s20 }
  0x73   : > { %s423_s2 = sshll.u32 %s419_s13, 4  ;;  %s401_s0 = scalar_lea.sflag [#allocation5], %s1078_s11  ;;  %s424_s2 = int_to_ptr.hbm [resolvable:$true] %s423_s2 }
  0x74   : > { %686 = vrsqrt.f32 %v379_v23  ;;  %vm386_vm0 = vweird.f32 %v379_v23  ;;  %s848_s7 = sshra.s32 %s424_s2, 4  ;;  %s854_s19 = scalar_lea.hbm %s1204_s4, 16  ;;  %s849_s7 = int_to_ptr.hbm [resolvable:$true] %s848_s7 }
  0x75   : > { %s850_s25 = scalar_lea.hbm %s849_s7, 8  ;;  %p855_p5 = scmp.lt.s32.totalorder %s849_s7, %s1204_s4 }
  0x76   : > { %p851_p3 = scmp.ne.s32.totalorder %s849_s7, %s850_s25  ;;  %p856_p7 = scmp.lt.s32.totalorder %s854_s19, %s850_s25 }
  0x78   : > { %p852_p4 = pnand %p851_p3, %p996_p11  ;;  %p857_p8 = por %p856_p7, %p855_p5 }
  0x7a   : > { %v687_v24 = vpop.eup %686  ;;  %p853_p0 = pneg %p852_p4 }
  0x7b   : > { %v381_v25 = vmul.f32 %v687_v24, %v379_v23  ;;  %vm387_vm1 = vweird.f32 %v687_v24 }
  0x7c   : > { %vm388_vm2 = vmor %vm386_vm0, %vm387_vm1  ;;  %p858_p10 = pnand %p857_p8, %p853_p0 }
  0x7d   : > { %v382_v26 = vmul.f32 %v687_v24, %v381_v25 }
  0x7f   : > { %v383_v27 = vmul.f32 0.5, %v382_v26 }
  0x81   : > { %v384_v28 = vsub.f32 1.5, %v383_v27 }
  0x83   : > { %v385_v30 = vmul.f32 %v687_v24, %v384_v28 }
  0x85   : > { %v389_v31 = vsel %vm388_vm2, %v687_v24, %v385_v30 }
  0x86   : > { %v390_v32 = vmin.f32 %v389_v31, 1e+08 }
  0x88   : > { %v396_v34 = vperm.slane %v390_v32, 0 }
  0x8a   : > { %v398_v35 = vmul.f32 %v396_v34, %v394_v33 }
  0x8c   : > { %399 = vst [vmem:[%s340_s29] sm:$0xff] %v398_v35 }
  0x8d   : > { %861 = shalt.err (!%p858_p10)
}
  0x8e   : > { %626 = dma.vmem_to_hbm [thread:$0]  (%p996_p11), %s422_s20, 128, %s424_s2, %s401_s0  }
  0x8f PF: > { %s461_s11 = sand.u32 1, %s896_s23   ;;  %p643_p1 = pnand %p610_p9, %p1000_p12 }
  0x90   : > { %s462_s15 = scalar_lea.sflag [#allocation5], %s461_s11 }
  0x91   : > { %p644_p6 = pneg %p643_p1 }
  0x93   : > { %887 = dma.done.wait (%p644_p6), %s462_s15, 128  }
  0x94   : > { %889 = vsyncadd (%p644_p6), %s462_s15, 4294967168  ;;  %s1218_s21 = sadd.s32 4294967294, %s908_s26  }
  0x95   : > { %s471_s30 = sand.u32 1, %s1218_s21  }
  0x96   : > { %s472_s8 = scalar_lea.sflag [#allocation11], %s471_s30 }
  0x97   : > { %891 = dma.done.wait (%p644_p6), %s472_s8, 32  }
  0x98   : > { %893 = vsyncadd (%p644_p6), %s472_s8, 4294967264  ;;  %s1219_s9 = sld [smem:[#allocation17_spill]]  ;;  %p27_p11 = scmp.ge.s32.totalorder %s973_s28, 4  }
  0x99   : > { %s1220_s25 = sld [smem:[#allocation18_spill]]  ;;  %s1221_s23 = smov %s900_s24 }
  0x9a   : > { %s1223_s26 = smov %s973_s28  ;;  %29 = sbr.rel (!%p27_p11) target bundleno = 12 (0xc), region = 137 }
  0x9e   : > { %s1222_s24 = smov %s1219_s9 }
  0x9f   :  { %486 = vsyncpa [#allocation4], 1 }
  0xa0   :  { %488 = vsyncpa [#allocation4 + $0x1], 1 }
  0xa1   :  { %489 = vsyncpa [#allocation7], 1 }
  0xa2   :  { %491 = vsyncpa [#allocation7 + $0x1], 1 }
  0xa3   :  { %492 = vsyncpa [#allocation5], 1 }
  0xa4   :  { %494 = vsyncpa [#allocation5 + $0x1], 1 }
  0xa5   :  { %495 = vsyncpa [#allocation11], 1 }
  0xa6   :  { %497 = vsyncpa [#allocation11 + $0x1], 1 }

</bundles_post_ra>
